<compile_context>
chip_gen: v7x
topology: tpu7x:2x2x1
jax: 0.10.0
libtpu: 0.0.40
codegen_flags: <defaults>
</compile_context>

<pallas_src>
import math
from functools import partial

import jax
import jax.numpy as jnp
from jax.experimental import pallas as pl
from jax.experimental.pallas import tpu as pltpu

NEG_INF = -1e30


def _pick_tile(total, want, align):
    """Largest t <= want with total % t == 0 and t % align == 0, else total."""
    want = min(want, total)
    t = want - (want % align)
    while t >= align:
        if total % t == 0:
            return t
        t -= align
    return total


# ----------------------------------------------------------------------------
# Tiled linear: out = x @ w + b  (grid over M, N, K; f32 accumulator scratch)
# ----------------------------------------------------------------------------
def _linear_kernel(x_ref, w_ref, b_ref, o_ref, acc_ref):
    @pl.when(pl.program_id(2) == 0)
    def _():
        acc_ref[...] = jnp.zeros_like(acc_ref)

    acc_ref[...] += jnp.dot(x_ref[...], w_ref[...],
                            preferred_element_type=jnp.float32)

    @pl.when(pl.program_id(2) == pl.num_programs(2) - 1)
    def _():
        o_ref[...] = (acc_ref[...] + b_ref[...].astype(jnp.float32)
                      ).astype(o_ref.dtype)


def pallas_linear(x, w, b, *, tm=256, tn=256, tk=256):
    # x: (M, K), w: (K, N), b: (N,) -> (M, N)
    M, K = x.shape
    N = w.shape[1]
    tm = _pick_tile(M, tm, 8)
    tn = _pick_tile(N, tn, 128)
    tk = _pick_tile(K, tk, 128)
    grid = (M // tm, N // tn, K // tk)
    return pl.pallas_call(
        _linear_kernel,
        out_shape=jax.ShapeDtypeStruct((M, N), x.dtype),
        grid_spec=pltpu.PrefetchScalarGridSpec(
            num_scalar_prefetch=0,
            grid=grid,
            in_specs=[
                pl.BlockSpec((tm, tk), lambda i, j, k: (i, k)),
                pl.BlockSpec((tk, tn), lambda i, j, k: (k, j)),
                pl.BlockSpec((1, tn), lambda i, j, k: (0, j)),
            ],
            out_specs=pl.BlockSpec((tm, tn), lambda i, j, k: (i, j)),
            scratch_shapes=[pltpu.VMEM((tm, tn), jnp.float32)],
        ),
        compiler_params=pltpu.CompilerParams(
            dimension_semantics=("parallel", "parallel", "arbitrary")),
    )(x, w, b.reshape(1, N))


# ----------------------------------------------------------------------------
# One-time RoPE pre-pass over q and k (hoisted out of the flash inner loop).
# Grid: (row_blocks, 2) -- second axis selects q (0, softmax scale folded in)
# or k (1) columns of the fused QKV buffer.  Output is a lane-dense (S, 2*dim)
# buffer in attn_dtype (bf16 by default -> native MXU rate downstream).
# ----------------------------------------------------------------------------
def _rope_kernel(qk_ref, cos_ref, sin_ref, o_ref, *, num_heads, head_dim, scale):
    half = head_dim // 2
    sc = jnp.where(pl.program_id(1) == 0, jnp.float32(scale), jnp.float32(1.0))
    cos = cos_ref[...] * sc                       # (tr, half) f32
    sin = sin_ref[...] * sc
    x = qk_ref[...].astype(jnp.float32)           # (tr, dim)
    outs = []
    for h in range(num_heads):
        lo = h * head_dim
        x1 = x[:, lo:lo + half]
        x2 = x[:, lo + half:lo + head_dim]
        outs.append(x1 * cos - x2 * sin)
        outs.append(x2 * cos + x1 * sin)
    # Single lane-dense full-width store (one-time pre-pass cost).
    o_ref[...] = jnp.concatenate(outs, axis=-1).astype(o_ref.dtype)


def pallas_rope_qk(qkv, rotary_pos_emb, num_heads, *,
                   out_dtype=jnp.bfloat16, tr=256):
    # qkv: (S, 3*dim) -> (S, 2*dim): cols [0,dim) = scale*RoPE(q), [dim,2dim) = RoPE(k)
    S = qkv.shape[0]
    dim = qkv.shape[1] // 3
    head_dim = dim // num_heads
    half = head_dim // 2
    scale = 1.0 / math.sqrt(head_dim)
    tr = _pick_tile(S, tr, 8)
    cos = jnp.cos(rotary_pos_emb).astype(jnp.float32)       # (S, half)
    sin = jnp.sin(rotary_pos_emb).astype(jnp.float32)

    kernel = partial(_rope_kernel, num_heads=num_heads, head_dim=head_dim,
                     scale=scale)
    return pl.pallas_call(
        kernel,
        out_shape=jax.ShapeDtypeStruct((S, 2 * dim), out_dtype),
        grid_spec=pltpu.PrefetchScalarGridSpec(
            num_scalar_prefetch=0,
            grid=(S // tr, 2),
            in_specs=[
                pl.BlockSpec((tr, dim), lambda r, c: (r, c)),
                pl.BlockSpec((tr, half), lambda r, c: (r, 0)),
                pl.BlockSpec((tr, half), lambda r, c: (r, 0)),
            ],
            out_specs=pl.BlockSpec((tr, dim), lambda r, c: (r, c)),
        ),
        compiler_params=pltpu.CompilerParams(
            dimension_semantics=("parallel", "arbitrary")),
    )(qkv, cos, sin)


# ----------------------------------------------------------------------------
# Flash-style varlen attention.  Grid: (num_q_blocks, num_kv_blocks).
# q/k already RoPE'd + scaled (bf16); heads looped statically; acc and l are
# lane-dense (tq, dim) f32 scratch so the epilogue is one full-width store.
# ----------------------------------------------------------------------------
def _flash_attn_kernel(kvlo_ref, kvhi_ref,                  # SMEM (prefetch)
                       segq_ref, segk_ref,                  # (tq,1), (1,tkv)
                       q_ref, k_ref, v_ref,                 # (tq,dim),(tkv,dim)x2
                       o_ref,                               # (tq, dim)
                       m_ref, l_ref, acc_ref,               # scratch
                       *, num_heads, head_dim):
    qi = pl.program_id(0)
    ki = pl.program_id(1)

    @pl.when(ki == 0)
    def _():
        m_ref[...] = jnp.full_like(m_ref, NEG_INF)
        l_ref[...] = jnp.zeros_like(l_ref)
        acc_ref[...] = jnp.zeros_like(acc_ref)

    # kv blocks entirely outside this q block's packed segments are skipped.
    active = jnp.logical_and(ki >= kvlo_ref[qi], ki <= kvhi_ref[qi])

    @pl.when(active)
    def _():
        # Additive segment-mask bias built once per (tq, tkv) tile, outside the
        # head loop.  Fully-masked leading blocks accumulate finite garbage at
        # m = -1e30 that is wiped by alpha = exp(-1e30 - finite) = 0 as soon as
        # the row's own segment appears (guaranteed within [kv_lo, kv_hi]).
        bias = jnp.where(segq_ref[...] == segk_ref[...], 0.0, NEG_INF)
        v_all = v_ref[...].astype(jnp.bfloat16)             # cast once per tile

        for h in range(num_heads):
            lo = h * head_dim
            q_h = q_ref[:, lo:lo + head_dim]                 # bf16, scale folded
            k_h = k_ref[:, lo:lo + head_dim]                 # bf16
            s = jax.lax.dot_general(
                q_h, k_h, (((1,), (1,)), ((), ())),
                preferred_element_type=jnp.float32) + bias   # (tq, tkv) f32

            m_prev = m_ref[h]                                # (tq, 1)
            m_new = jnp.maximum(m_prev, jnp.max(s, axis=-1, keepdims=True))
            alpha = jnp.exp(m_prev - m_new)                  # (tq, 1)
            p = jnp.exp(s - m_new)                           # (tq, tkv) f32

            l_ref[:, lo:lo + head_dim] = (
                alpha * l_ref[:, lo:lo + head_dim]
                + jnp.sum(p, axis=-1, keepdims=True))
            acc_ref[:, lo:lo + head_dim] = (
                alpha * acc_ref[:, lo:lo + head_dim]
                + jnp.dot(p.astype(jnp.bfloat16), v_all[:, lo:lo + head_dim],
                          preferred_element_type=jnp.float32))
            m_ref[h] = m_new

    @pl.when(ki == pl.num_programs(1) - 1)
    def _():
        # Single lane-dense full-width normalize + store (no concat, no padding).
        o_ref[...] = (acc_ref[...] *
                      pl.reciprocal(l_ref[...], approx=True)).astype(o_ref.dtype)


def pallas_varlen_flash_attention(qkv, seg, cu_seqlens, rotary_pos_emb,
                                  num_heads, *, tq=256, tkv=256,
                                  attn_dtype=jnp.bfloat16):
    # qkv: (S, 3*dim); seg: (S,) int32 segment ids; rotary_pos_emb: (S, head_dim//2)
    S = qkv.shape[0]
    dim = qkv.shape[1] // 3
    head_dim = dim // num_heads
    out_dtype = qkv.dtype

    tq = _pick_tile(S, tq, 8)
    tkv = _pick_tile(S, tkv, 128)
    nq, nk = S // tq, S // tkv

    seg = seg.astype(jnp.int32)
    seg_col = seg.reshape(S, 1)
    seg_row = seg.reshape(1, S)

    # Per-q-block kv-block range (block-diagonal varlen mask) for block skipping.
    cu = cu_seqlens.astype(jnp.int32)
    q_first_seg = seg[::tq]                                  # (nq,)
    q_last_seg = seg[tq - 1::tq]                             # (nq,)
    kv_lo = (cu[q_first_seg] // tkv).astype(jnp.int32)
    kv_hi = ((cu[q_last_seg + 1] - 1) // tkv).astype(jnp.int32)

    def kv_block(qi, ki, lo, hi):
        # Clamp so skipped steps re-reference an already-fetched block (no DMA).
        return jnp.minimum(jnp.maximum(ki, lo[qi]), hi[qi])

    if dim % 128 == 0:
        # RoPE pre-pass; q/k read from the lane-dense (S, 2*dim) bf16 buffer,
        # v straight from the fused (S, 3*dim) QKV buffer (column block 2).
        qk_rot = pallas_rope_qk(qkv, rotary_pos_emb, num_heads,
                                out_dtype=attn_dtype)
        q_arr, k_arr, v_arr = qk_rot, qk_rot, qkv
        k_col, v_col = 1, 2
    else:
        # TODO(synk): dim not a multiple of 128 -> do RoPE in plain jnp and pay
        # one extra HBM round trip for separately sliced q/k/v buffers.
        half = head_dim // 2
        scale = 1.0 / math.sqrt(head_dim)
        q = qkv[:, :dim].reshape(S, num_heads, head_dim).astype(jnp.float32)
        k = qkv[:, dim:2 * dim].reshape(S, num_heads, head_dim).astype(jnp.float32)
        cos = jnp.cos(rotary_pos_emb)[:, None, :].astype(jnp.float32)
        sin = jnp.sin(rotary_pos_emb)[:, None, :].astype(jnp.float32)

        def rope(x):
            x1, x2 = x[..., :half], x[..., half:]
            return jnp.concatenate([x1 * cos - x2 * sin, x2 * cos + x1 * sin], -1)

        q_arr = (rope(q) * scale).reshape(S, dim).astype(attn_dtype)
        k_arr = rope(k).reshape(S, dim).astype(attn_dtype)
        v_arr = qkv[:, 2 * dim:]
        k_col, v_col = 0, 0

    q_spec = pl.BlockSpec((tq, dim), lambda qi, ki, lo, hi: (qi, 0))
    k_spec = pl.BlockSpec(
        (tkv, dim), lambda qi, ki, lo, hi: (kv_block(qi, ki, lo, hi), k_col))
    v_spec = pl.BlockSpec(
        (tkv, dim), lambda qi, ki, lo, hi: (kv_block(qi, ki, lo, hi), v_col))

    kernel = partial(_flash_attn_kernel, num_heads=num_heads, head_dim=head_dim)
    return pl.pallas_call(
        kernel,
        out_shape=jax.ShapeDtypeStruct((S, dim), out_dtype),
        grid_spec=pltpu.PrefetchScalarGridSpec(
            num_scalar_prefetch=2,
            grid=(nq, nk),
            in_specs=[
                pl.BlockSpec((tq, 1), lambda qi, ki, lo, hi: (qi, 0)),     # seg_q
                pl.BlockSpec((1, tkv),
                             lambda qi, ki, lo, hi: (0, kv_block(qi, ki, lo, hi))),
                q_spec, k_spec, v_spec,
            ],
            out_specs=pl.BlockSpec((tq, dim), lambda qi, ki, lo, hi: (qi, 0)),
            scratch_shapes=[
                pltpu.VMEM((num_heads, tq, 1), jnp.float32),   # m (per head)
                pltpu.VMEM((tq, dim), jnp.float32),            # l (lane-dense)
                pltpu.VMEM((tq, dim), jnp.float32),            # acc (lane-dense)
            ],
        ),
        compiler_params=pltpu.CompilerParams(
            dimension_semantics=("parallel", "arbitrary")),
    )(kv_lo, kv_hi, seg_col, seg_row, q_arr, k_arr, v_arr)


# ----------------------------------------------------------------------------
# Full module forward (glue around the Pallas kernels).
# ----------------------------------------------------------------------------
def qwen25_vl_vision_attention(hidden_states, cu_seqlens, rotary_pos_emb,
                               params, num_heads):
    S = hidden_states.shape[0]

    # Fused QKV projection (tiled Pallas matmul).  Output layout (S, 3*dim) with
    # feature index = comp*dim + head*head_dim + d, consumed in place downstream.
    qkv = pallas_linear(hidden_states, params["qkv_w"], params["qkv_b"])

    # flash_attn_varlen semantics: tokens only attend within their cu_seqlens
    # segment (non-causal).  Segment ids are O(S) and cheap.
    pos = jnp.arange(S, dtype=jnp.int32)
    seg = (jnp.searchsorted(cu_seqlens, pos, side="right") - 1).astype(jnp.int32)

    attn = pallas_varlen_flash_attention(qkv, seg, cu_seqlens, rotary_pos_emb,
                                         num_heads)             # (S, dim)

    # Output projection (tiled Pallas matmul).
    return pallas_linear(attn, params["proj_w"], params["proj_b"])


# ----------------------------------------------------------------------------
# Pure-JAX reference (mirrors the PyTorch forward) for a correctness check.
# ----------------------------------------------------------------------------
def reference_forward(hidden_states, cu_seqlens, rotary_pos_emb, params, num_heads):
    hp = jax.lax.Precision.HIGHEST
    S, dim = hidden_states.shape
    head_dim = dim // num_heads
    half = head_dim // 2

    qkv = jnp.dot(hidden_states, params["qkv_w"], precision=hp) + params["qkv_b"]
    qkv = qkv.reshape(S, 3, num_heads, head_dim)
    q, k, v = qkv[:, 0], qkv[:, 1], qkv[:, 2]  # (S, H, D)

    cos = jnp.cos(rotary_pos_emb)[:, None, :]
    sin = jnp.sin(rotary_pos_emb)[:, None, :]

    def rope(x):
        x1, x2 = x[..., :half], x[..., half:]
        return jnp.concatenate([x1 * cos - x2 * sin, x2 * cos + x1 * sin], axis=-1)

    q = rope(q)
    k = rope(k)

    pos = jnp.arange(S)
    seg = jnp.searchsorted(cu_seqlens, pos, side="right") - 1
    mask = seg[:, None] == seg[None, :]

    scale = 1.0 / math.sqrt(head_dim)
    s = jnp.einsum("qhd,khd->hqk", q, k, precision=hp) * scale
    s = jnp.where(mask[None], s, -1e9)
    p = jax.nn.softmax(s, axis=-1)
    o = jnp.einsum("hqk,khd->qhd", p, v, precision=hp).reshape(S, dim)
    return jnp.dot(o, params["proj_w"], precision=hp) + params["proj_b"]


if __name__ == "__main__":
    # Small shapes consistent with the module: dim=128, num_heads=4 -> head_dim=32.
    # S=384 exercises multi-tile flash iteration, intra-tile segment masking
    # (boundary at 100) and kv-block skipping / alpha-wipe (3 packed segments).
    dim, num_heads, seq = 128, 4, 384
    head_dim = dim // num_heads

    key = jax.random.PRNGKey(0)
    k1, k2, k3, k4, k5, k6 = jax.random.split(key, 6)

    # Parameters stored as (in, out) so the kernel computes x @ W + b,
    # equivalent to torch's x @ W_torch.T + b.
    params = {
        "qkv_w": 0.05 * jax.random.normal(k1, (dim, 3 * dim), jnp.float32),
        "qkv_b": 0.05 * jax.random.normal(k2, (3 * dim,), jnp.float32),
        "proj_w": 0.05 * jax.random.normal(k3, (dim, dim), jnp.float32),
        "proj_b": 0.05 * jax.random.normal(k4, (dim,), jnp.float32),
    }

    hidden_states = jax.random.normal(k5, (seq, dim), jnp.float32)
    rotary_pos_emb = 3.0 * jax.random.uniform(k6, (seq, head_dim // 2), jnp.float32)
    cu_seqlens = jnp.array([0, 100, 256, 384], dtype=jnp.int32)  # 3 packed sequences

    out = qwen25_vl_vision_attention(hidden_states, cu_seqlens, rotary_pos_emb,
                                     params, num_heads)
    out = jax.block_until_ready(out)

    ref = reference_forward(hidden_states, cu_seqlens, rotary_pos_emb,
                            params, num_heads)
    assert out.shape == (seq, dim) and out.dtype == jnp.float32
    max_diff = jnp.max(jnp.abs(out - ref))
    assert jnp.allclose(out, ref, atol=2e-2, rtol=2e-2), (
        f"max abs diff {max_diff}")

    print("KERNEL_OK")
</pallas_src>

<mosaic_0001>
module attributes {stable_mosaic.version = 11 : i64} {
  func.func @_linear_kernel(%arg0: i32, %arg1: i32, %arg2: i32, %arg3: memref<192x128xf32, #tpu.memory_space<vmem>>, %arg4: memref<128x128xf32, #tpu.memory_space<vmem>>, %arg5: memref<1x128xf32, #tpu.memory_space<vmem>>, %arg6: memref<192x128xf32, #tpu.memory_space<vmem>>, %arg7: memref<192x128xf32, #tpu.memory_space<vmem>>) attributes {dimension_semantics = [#tpu.dimension_semantics<parallel>, #tpu.dimension_semantics<parallel>, #tpu.dimension_semantics<arbitrary>], iteration_bounds = array<i64: 2, 3, 1>, scalar_prefetch = 0 : i64, scratch_operands = 1 : i64, tpu.core_type = #tpu.core_type<tc>, window_params = [{transform_indices = @transform_0, window_bounds = array<i64: 192, 128>}, {transform_indices = @transform_1, window_bounds = array<i64: 128, 128>}, {transform_indices = @transform_2, window_bounds = array<i64: 1, 128>}, {transform_indices = @transform_3, window_bounds = array<i64: 192, 128>}]} {
    %c0_i32 = arith.constant 0 : i32
    %0 = arith.cmpi eq, %arg2, %c0_i32 : i32
    %1 = arith.extui %0 : i1 to i32
    %c0_i32_0 = arith.constant 0 : i32
    %2 = arith.cmpi ne, %1, %c0_i32_0 : i32
    scf.if %2 {
      %cst_10 = arith.constant 0.000000e+00 : f32
      %12 = vector.broadcast %cst_10 : f32 to vector<192x128xf32>
      %c0_11 = arith.constant 0 : index
      %c0_12 = arith.constant 0 : index
      %13 = vector.load %arg7[%c0_11, %c0_12] : memref<192x128xf32, #tpu.memory_space<vmem>>, vector<192x128xf32>
      tpu.vector_store %arg7[%c0_11, %c0_12], %12 {strides = array<i32>} : memref<192x128xf32, #tpu.memory_space<vmem>>, vector<192x128xf32>,
    } else {
    }
    %c0 = arith.constant 0 : index
    %c0_1 = arith.constant 0 : index
    %3 = vector.load %arg7[%c0, %c0_1] : memref<192x128xf32, #tpu.memory_space<vmem>>, vector<192x128xf32>
    %c0_2 = arith.constant 0 : index
    %c0_3 = arith.constant 0 : index
    %4 = vector.load %arg3[%c0_2, %c0_3] : memref<192x128xf32, #tpu.memory_space<vmem>>, vector<192x128xf32>
    %c0_4 = arith.constant 0 : index
    %c0_5 = arith.constant 0 : index
    %5 = vector.load %arg4[%c0_4, %c0_5] : memref<128x128xf32, #tpu.memory_space<vmem>>, vector<128x128xf32>
    %cst = arith.constant dense<0.000000e+00> : vector<192x128xf32>
    %6 = tpu.matmul %4, %5, %cst {dimension_numbers = #tpu.dot_dimension_numbers<[1], [0], [0], [1], [0, 0, 1, 1], [], []>} : vector<192x128xf32>, vector<128x128xf32>, vector<192x128xf32> -> vector<192x128xf32>
    %7 = arith.addf %3, %6 : vector<192x128xf32>
    %c0_6 = arith.constant 0 : index
    %c0_7 = arith.constant 0 : index
    %8 = vector.load %arg7[%c0_6, %c0_7] : memref<192x128xf32, #tpu.memory_space<vmem>>, vector<192x128xf32>
    tpu.vector_store %arg7[%c0_6, %c0_7], %7 {strides = array<i32>} : memref<192x128xf32, #tpu.memory_space<vmem>>, vector<192x128xf32>,
    %c0_i32_8 = arith.constant 0 : i32
    %9 = arith.cmpi eq, %arg2, %c0_i32_8 : i32
    %10 = arith.extui %9 : i1 to i32
    %c0_i32_9 = arith.constant 0 : i32
    %11 = arith.cmpi ne, %10, %c0_i32_9 : i32
    scf.if %11 {
      %c0_10 = arith.constant 0 : index
      %c0_11 = arith.constant 0 : index
      %12 = vector.load %arg7[%c0_10, %c0_11] : memref<192x128xf32, #tpu.memory_space<vmem>>, vector<192x128xf32>
      %c0_12 = arith.constant 0 : index
      %c0_13 = arith.constant 0 : index
      %13 = vector.load %arg5[%c0_12, %c0_13] : memref<1x128xf32, #tpu.memory_space<vmem>>, vector<1x128xf32>
      %14 = vector.broadcast %13 : vector<1x128xf32> to vector<192x128xf32>
      %15 = arith.addf %12, %14 : vector<192x128xf32>
      %c0_14 = arith.constant 0 : index
      %c0_15 = arith.constant 0 : index
      %16 = vector.load %arg6[%c0_14, %c0_15] : memref<192x128xf32, #tpu.memory_space<vmem>>, vector<192x128xf32>
      tpu.vector_store %arg6[%c0_14, %c0_15], %15 {strides = array<i32>} : memref<192x128xf32, #tpu.memory_space<vmem>>, vector<192x128xf32>,
    } else {
    }
    return
  }
  func.func @transform_0(%arg0: i32, %arg1: i32, %arg2: i32) -> (i32, i32) {
    %c0_i32 = arith.constant 0 : i32
    return %arg0, %arg2 : i32, i32
  }
  func.func @transform_1(%arg0: i32, %arg1: i32, %arg2: i32) -> (i32, i32) {
    %c0_i32 = arith.constant 0 : i32
    return %arg2, %arg1 : i32, i32
  }
  func.func @transform_2(%arg0: i32, %arg1: i32, %arg2: i32) -> (i32, i32) {
    %c0_i32 = arith.constant 0 : i32
    %c0_i32_0 = arith.constant 0 : i32
    return %c0_i32, %arg1 : i32, i32
  }
  func.func @transform_3(%arg0: i32, %arg1: i32, %arg2: i32) -> (i32, i32) {
    %c0_i32 = arith.constant 0 : i32
    return %arg0, %arg1 : i32, i32
  }
}

</mosaic_0001>

<bundles_post_ra>
// kernel: tpu_custom_call.1
= control target key start
LH: loop header
LB: loop body
LE: loop exit
PB: predicated region body
PF: predicated region fallthrough
CT: control target
= control target key end

     0   :  { %s1826_s0 = inlined_call_operand.hbm [shape: f32[384,128], index: 0, kind: input, shape index: {}]   ;;  %s1827_s1 = inlined_call_operand.hbm [shape: f32[128,384], index: 1, kind: input, shape index: {}]   ;;  %s1828_s2 = inlined_call_operand.vmem [shape: f32[1,384], index: 2, kind: input, shape index: {}]   ;;  %s1829_s3 = inlined_call_operand.hbm [shape: f32[384,384], index: 3, kind: output, shape index: {}]  }
   0x1   :  { %1843 = sst [smem:[#allocation18_spill]] %s1826_s0 }
   0x2   :  { %1844 = sst [smem:[#allocation19_spill]] %s1828_s2 }
   0x3   :  { %1845 = sst [smem:[#allocation20_spill]] %s1829_s3 }
   0x4   :  { %8 = vsyncpa [#allocation4], 0 }
   0x5   :  { %10 = vsyncpa [#allocation4 + $0x1], 0 }
   0x6   :  { %11 = vsyncpa [#allocation7], 0 }
   0x7   :  { %13 = vsyncpa [#allocation7 + $0x1], 0 }
   0x8   :  { %14 = vsyncpa [#allocation5], 0 }
   0x9   :  { %16 = vsyncpa [#allocation5 + $0x1], 0  ;;  %s1375_s12 = smov 0   ;;  %s1377_s13 = smov 0  }
   0xa   :  { %s1379_s14 = smov 0   ;;  %s1381_s15 = smov 0  }
   0xb   :  { %s1383_s16 = smov 0   ;;  %s1385_s17 = smov 0  }
   0xc   :  { %s1387_s18 = smov 0   ;;  %s1389_s19 = smov 0  }
   0xd   :  { %s1391_s20 = smov 0   ;;  %s1393_s21 = smov 0  }
   0xe   :  { %s1395_s22 = smov 0   ;;  %s1397_s23 = smov 0  }
   0xf   :  { %s1399_s24 = smov 0   ;;  %s1401_s25 = smov 0  }
  0x10 LB: > { %1846 = sst [smem:[#allocation12_spill]] %s1332_s22  ;;  %s822_s26 = sadd.s32 4294967295, %s1344_s25   ;;  %s1344_s25 = sphi %s1401_s25, %s22_s25   ;;  %s1340_s24 = sphi %s1399_s24, %s1882_s24   ;;  %s1336_s23 = sphi %s1397_s23, %s1893_s23   ;;  %s1332_s22 = sphi %s1395_s22, %s1880_s22   ;;  %s1328_s21 = sphi %s1393_s21, %s1892_s21   ;;  %s1324_s20 = sphi %s1391_s20, %s1891_s20   ;;  %s1320_s19 = sphi %s1389_s19, %s1890_s19   ;;  %s1316_s18 = sphi %s1387_s18, %s1889_s18   ;;  %s1312_s17 = sphi %s1385_s17, %s1888_s17   ;;  %s1308_s16 = sphi %s1383_s16, %s1887_s16   ;;  %s1304_s15 = sphi %s1381_s15, %s1886_s15   ;;  %s1300_s14 = sphi %s1379_s14, %s1885_s14   ;;  %s1296_s13 = sphi %s1377_s13, %s1884_s13   ;;  %s1292_s12 = sphi %s1375_s12, %s1883_s12  }
  0x11   : > { %1847 = sst [smem:[#allocation13_spill]] %s1340_s24  ;;  %p57_p0 = scmp.ne.s32.totalorder %s1324_s20, %s1320_s19 }
  0x12   : > { %p1832_p1 = scmp.eq.s32.totalorder %s1344_s25, 0  ;;  %p63_p2 = scmp.ne.s32.totalorder %s1320_s19, %s1316_s18 }
  0x13   : > { %p1450_p3 = scmp.eq.s32.totalorder %s822_s26, 0  ;;  %p1454_p4 = scmp.eq.s32.totalorder %s822_s26, 5 }
  0x14   : > { %p59_p5 = por %p1832_p1, %p57_p0  ;;  %p1831_p7 = scmp.lt.s32.totalorder %s1344_s25, 6 }
  0x15   : > { %s1849_s30 = scalar_select %p1454_p4, 1, 0 }
  0x16   : > { %p1462_p6 = por %p1450_p3, %p63_p2  ;;  %s169_s5 = sand.u32 1, %s1324_s20  }
  0x17   : > { %s835_s6 = smul.u32 3072, %s1340_s24  ;;  %s1851_s0 = sld [smem:[#allocation18_spill]] }
  0x18   : > { %s1850_s4 = scalar_select %p1462_p6, 1, 0 }
  0x19   : > { %s992_s7 = smul.u32 192, %s169_s5  ;;  %p1476_p8 = pnand %p1831_p7, %p59_p5 }
  0x1a   : > { %s1482_s28 = scalar_lea.sflag [#allocation4], %s169_s5 }
  0x1b   : > { %s173_s18 = scalar_lea.vmem [#allocation3], %s992_s7  ;;  %p1136_p10 = pneg %p1476_p8 }
  0x1c   : > { %s181_s26 = sshll.u32 %s173_s18, 4  ;;  %s1480_s26 = int_to_ptr.vmem [resolvable:$true] %s181_s26 }
  0x1d   : > { %s1472_s10 = scalar_lea.hbm %s1851_s0, %s835_s6  ;;  %s1139_s27 = scalar_lea.hbm %s1851_s0, 6144 }
  0x1e   : > { %s1134_s8 = scalar_lea.hbm %s1472_s10, 3072  ;;  %p1140_p13 = scmp.lt.u32.totalorder %s1472_s10, %s1851_s0 }
  0x1f   : > { %p1135_p9 = scmp.ne.s32.totalorder %s1472_s10, %s1134_s8  ;;  %p1141_p0 = scmp.lt.u32.totalorder %s1139_s27, %s1134_s8 }
  0x20   : > { %p1143_p5 = scmp.lt.u32.totalorder %s1134_s8, %s1472_s10 }
  0x21   : > { %p1137_p11 = pnand %p1136_p10, %p1135_p9  ;;  %p1142_p2 = por %p1141_p0, %p1140_p13 }
  0x23   : > { %p1138_p12 = pneg %p1137_p11  ;;  %p1144_p7 = por %p1143_p5, %p1142_p2 }
  0x25   : > { %p1145_p1 = pnand %p1144_p7, %p1138_p12 }
  0x27   : > { %1148 = shalt.err (!%p1145_p1)
}
  0x28   : > { %s1149_s5 = scalar_lea.vmem %s1480_s26, 3072  ;;  %s1346_s7 = smov [#allocation3]  }
  0x29   : > { %p1150_p9 = scmp.ne.s32.totalorder %s1480_s26, %s1149_s5  ;;  %s1154_s18 = sshll.u32 %s1346_s7, 4  ;;  %s1155_s18 = int_to_ptr.vmem [resolvable:$false] %s1154_s18 }
  0x2a   : > { %s1156_s3 = scalar_lea.vmem %s1155_s18, 6144  ;;  %p1157_p4 = scmp.lt.s32.totalorder %s1480_s26, %s1155_s18 }
  0x2b   : > { %p1152_p11 = pnand %p1150_p9, %p1136_p10  ;;  %p1158_p13 = scmp.lt.s32.totalorder %s1156_s3, %s1149_s5 }
  0x2d   : > { %p1153_p6 = pneg %p1152_p11  ;;  %p1159_p0 = por %p1158_p13, %p1157_p4 }
  0x2f   : > { %p1160_p2 = pnand %p1159_p0, %p1153_p6 }
  0x31   : > { %1163 = shalt.err (!%p1160_p2)
}
  0x32   : > { %s1834_s22 = smov 128   ;;  %s1835_s27 = smov 8  }
  0x33   : > { %1005 = dma.hbm_to_vmem [thread:$0]  (!%p1476_p8), %s1472_s10, 3072, %s1480_s26, %s1482_s28, %s1834_s22, %s1834_s22, %s1835_s27  }
  0x34   : > { %p829_p1 = scmp.ge.s32.totalorder %s1344_s25, 1  ;;  %p218_p4 = scmp.lt.s32.totalorder %s1344_s25, 7 }
  0x35   : > { %s823_s6 = sadd.s32 4294967294, %s1344_s25   ;;  %s37_s9 = sadd.s32 1, %s1336_s23 }
  0x36   : > { %p1515_p6 = pnand %p829_p1, %p218_p4  ;;  %s78_s5 = sadd.s32 1, %s1312_s17 }
  0x37   : > { %p39_p7 = scmp.ge.s32.totalorder %s37_s9, 3  ;;  %p85_p10 = scmp.ne.s32.totalorder %s1312_s17, %s1308_s16 }
  0x38   : > { %p91_p12 = scmp.ne.s32.totalorder %s1308_s16, %s1304_s15  ;;  %s132_s11 = sadd.s32 1, %s1300_s14 }
  0x39   : > { %s1895_s9 = smov (%p39_p7, %s37_s9), 0  ;;  %s1855_s28 = sadd.s32 1, %s1340_s24 }
  0x3a   : > { %1854 = sst [smem:[#allocation14_spill]] %s1895_s9  ;;  %s1897_s28 = smov (!%p39_p7, %s1855_s28), %s1340_s24 }
  0x3b   : > { %s74_s10 = ssub.s32 %s1336_s23, %s1895_s9  ;;  %p1856_p8 = scmp.eq.s32.totalorder %s1344_s25, 0 }
  0x3c   : > { %p43_p9 = scmp.ge.s32.totalorder %s1897_s28, 2  ;;  %p76_p11 = scmp.eq.s32.totalorder %s74_s10, 0 }
  0x3d   : > { %p1536_p5 = por %p85_p10, %p1856_p8  ;;  %p1542_p13 = por %p91_p12, %p1450_p3 }
  0x3e   : > { %p142_p0 = scmp.ne.s32.totalorder %s1300_s14, %s1296_s13  ;;  %s1899_s28 = smov (%p43_p9, %s1897_s28), 0 }
  0x3f   : > { %s1858_s15 = scalar_select %p1542_p13, 1, 0 }
  0x40   : > { %1859 = sst [smem:[#allocation15_spill]] %s1899_s28  ;;  %s45_s18 = ssub.s32 %s1340_s24, %s1899_s28 }
  0x41   : > { %s1551_s7 = scalar_select %p76_p11, %s1312_s17, %s78_s5  }
  0x42   : > { %p1861_p2 = scmp.ne.s32.totalorder %s1849_s30, 0  ;;  %p48_p4 = scmp.eq.s32.totalorder %s45_s18, 0 }
  0x43   : > { %1860 = sst [smem:[#allocation16_spill]] %s1551_s7  ;;  %s129_s29 = sor.u32 %s74_s10, %s45_s18 }
  0x44   : > { %p1557_p1 = por %p1861_p2, %p142_p0  ;;  %p130_p3 = scmp.eq.s32.totalorder %s129_s29, 0 }
  0x45   : > { %p148_p7 = scmp.ne.s32.totalorder %s1296_s13, %s1292_s12  ;;  %s1864_s22 = sadd.s32 1, %s1324_s20 }
  0x46   : > { %s1862_s3 = scalar_select %p1557_p1, 1, 0 }
  0x47   : > { %s1566_s27 = scalar_select %p48_p4, %s1324_s20, %s1864_s22  }
  0x48   : > { %1863 = sst [smem:[#allocation17_spill]] %s1862_s3  ;;  %p149_p10 = scmp.eq.s32.totalorder %s823_s6, 5 }
  0x49   : > { %s1569_s0 = scalar_select %p130_p3, %s1300_s14, %s132_s11  }
  0x4a   : > { %s191_s5 = sand.u32 1, %s1312_s17   ;;  %p1572_p12 = por %p149_p10, %p148_p7 }
  0x4b   : > { %s827_s9 = sshll.u32 %s191_s5, 7  ;;  %s828_s28 = sshll.u32 %s1336_s23, 7 }
  0x4c   : > { %s1865_s30 = scalar_select %p1572_p12, 1, 0 }
  0x4d   : > { %s195_s24 = scalar_lea.vmem [#allocation6], %s827_s9  ;;  %s1580_s10 = scalar_lea.hbm %s1827_s1, %s828_s28 }
  0x4e   : > { %s204_s7 = sshll.u32 %s195_s24, 4  ;;  %p1866_p8 = scmp.lt.s32.totalorder %s1344_s25, 6  ;;  %s1582_s7 = int_to_ptr.vmem [resolvable:$true] %s204_s7 }
  0x4f   : > { %s1592_s24 = scalar_lea.sflag [#allocation7], %s191_s5  ;;  %s1164_s6 = scalar_lea.hbm %s1580_s10, 2048 }
  0x50   : > { %p1588_p9 = pnand %p1866_p8, %p1536_p5  ;;  %p1165_p11 = scmp.ne.s32.totalorder %s1580_s10, %s1164_s6 }
  0x51   : > { %s1169_s11 = scalar_lea.hbm %s1827_s1, 6144  ;;  %p1170_p5 = scmp.lt.u32.totalorder %s1580_s10, %s1827_s1 }
  0x52   : > { %p1166_p0 = pneg %p1588_p9  ;;  %p1171_p3 = scmp.lt.u32.totalorder %s1169_s11, %s1164_s6 }
  0x53   : > { %p1173_p10 = scmp.lt.u32.totalorder %s1164_s6, %s1580_s10 }
  0x54   : > { %p1167_p2 = pnand %p1166_p0, %p1165_p11  ;;  %p1172_p7 = por %p1171_p3, %p1170_p5 }
  0x56   : > { %p1168_p4 = pneg %p1167_p2  ;;  %p1174_p8 = por %p1173_p10, %p1172_p7 }
  0x58   : > { %p1175_p12 = pnand %p1174_p8, %p1168_p4 }
  0x5a   : > { %1178 = shalt.err (!%p1175_p12)
}
  0x5b   : > { %s1179_s18 = scalar_lea.vmem %s1582_s7, 2048  ;;  %s1349_s3 = smov [#allocation6]  }
  0x5c   : > { %p1180_p11 = scmp.ne.s32.totalorder %s1582_s7, %s1179_s18  ;;  %s1184_s29 = sshll.u32 %s1349_s3, 4  ;;  %s1185_s29 = int_to_ptr.vmem [resolvable:$false] %s1184_s29 }
  0x5d   : > { %s1186_s5 = scalar_lea.vmem %s1185_s29, 4096  ;;  %p1187_p13 = scmp.lt.s32.totalorder %s1582_s7, %s1185_s29 }
  0x5e   : > { %p1182_p2 = pnand %p1180_p11, %p1166_p0  ;;  %p1188_p5 = scmp.lt.s32.totalorder %s1186_s5, %s1179_s18 }
  0x60   : > { %p1183_p1 = pneg %p1182_p2  ;;  %p1189_p3 = por %p1188_p5, %p1187_p13 }
  0x62   : > { %p1190_p7 = pnand %p1189_p3, %p1183_p1 }
  0x64   : > { %1193 = shalt.err (!%p1190_p7)
}
  0x65   : > { %s1350_s6 = smov 384   ;;  %s1868_s2 = smov 8  }
  0x66   : > { %s1869_s9 = smov 128   ;;  %222 = sbr.rel (%p1515_p6) target bundleno = 400 (0x190), region = 32 }
  0x67   : > { %1008 = dma.hbm_to_vmem [thread:$0]  (!%p1588_p9), %s1580_s10, 2048, %s1582_s7, %s1592_s24, %s1350_s6, %s1869_s9, %s1868_s2  }
  0x68   : > { %s224_s11 = sand.u32 (!%p1515_p6), 1, %s1320_s19   ;;  %p1870_p13 = scmp.ne.s32.totalorder (!%p1515_p6), %s1850_s4, 0 }
  0x69   : > { %s993_s28 = smul.u32 (!%p1515_p6), 192, %s224_s11  ;;  %s225_s26 = scalar_lea.sflag (!%p1515_p6), [#allocation4], %s224_s11 }
  0x6b   : > { %s1625_s18 = scalar_lea.vmem (!%p1515_p6), [#allocation3], %s993_s28 }
  0x6d   : > { %1279 = dma.done.wait (%p1870_p13), %s225_s26, 3072  }
  0x6e   : > { %1281 = vsyncadd (%p1870_p13), %s225_s26, 4294964224  ;;  %s233_s22 = sand.u32 1, %s1308_s16   ;;  %p1871_p6 = scmp.ne.s32.totalorder %s1858_s15, 0 }
  0x6f   : > { %s830_s3 = sshll.u32 %s233_s22, 7  ;;  %s234_s7 = scalar_lea.sflag [#allocation7], %s233_s22 }
  0x70   : > { %s1632_s10 = scalar_lea.vmem [#allocation6], %s830_s3 }
  0x71   : > { %1283 = dma.done.wait (%p1871_p6), %s234_s7, 2048  }
  0x72   : > { %1285 = vsyncadd (%p1871_p6), %s234_s7, 4294965248  ;;  %v350_v0 = vld [vmem:[%s1632_s10] sm:$0xff]  ;;  %v351_v1 = vld [vmem:[%s1632_s10 + $0x8] sm:$0xff]  ;;  %p270_p1 = scmp.lt.s32.totalorder %s1328_s21, 2  ;;  %s265_s8 = sand.u32 1, %s1296_s13  }
  0x73   : > { %v352_v2 = vld [vmem:[%s1632_s10 + $0x10] sm:$0xff]  ;;  %v944_v3 = vpack.c.bf16 %v351_v1, %v350_v0  ;;  %v353_v4 = vld [vmem:[%s1632_s10 + $0x18] sm:$0xff]  ;;  %v354_v6 = vld [vmem:[%s1632_s10 + $0x20] sm:$0xff]  ;;  %s1872_s29 = sld [smem:[#allocation19_spill]]  ;;  %s994_s6 = smul.u32 192, %s265_s8 }
  0x74   : > { %v948_v5 = vpack.c.bf16 %v353_v4, %v352_v2  ;;  %v355_v7 = vld [vmem:[%s1632_s10 + $0x28] sm:$0xff]  ;;  %v326_v9 = vld [vmem:[%s1625_s18] sm:$0xff]  ;;  %v356_v11 = vld [vmem:[%s1632_s10 + $0x30] sm:$0xff]  ;;  %s271_s4 = scalar_select %p270_p1, %s1328_s21, 2 }
  0x75   : > { %945 = vmatprep.subr.bf16.mxu0 %v944_v3  ;;  %976 = vmatprep.subr.bf16.mxu1 %v944_v3  ;;  %v952_v8 = vpack.c.bf16 %v355_v7, %v354_v6  ;;  %v338_v10 = vld [vmem:[%s1625_s18 + $0x60] sm:$0xff]  ;;  %v357_v12 = vld [vmem:[%s1632_s10 + $0x38] sm:$0xff]  ;;  %v359_v15 = vld [vmem:[%s1632_s10 + $0x48] sm:$0xff]  ;;  %s1692_s2 = scalar_lea.vmem [#allocation8], %s994_s6  ;;  %s1873_s9 = sld [smem:[#allocation12_spill]] }
  0x76   : > { %947 = vmatpush3.bf16.msra.mxu0 %v944_v3  ;;  %984 = vmatpush3.bf16.msra.mxu1 %v944_v3  ;;  %v956_v13 = vpack.c.bf16 %v357_v12, %v356_v11  ;;  %v358_v14 = vld [vmem:[%s1632_s10 + $0x40] sm:$0xff]  ;;  %v360_v17 = vld [vmem:[%s1632_s10 + $0x50] sm:$0xff]  ;;  %v361_v18 = vld [vmem:[%s1632_s10 + $0x58] sm:$0xff]  ;;  %s1874_s3 = sld [smem:[#allocation20_spill]]  ;;  %s1875_s7 = sld [smem:[#allocation17_spill]] }
  0x77   : > { %949 = vmatprep.subr.bf16.mxu0 %v948_v5  ;;  %977 = vmatprep.subr.bf16.mxu1 %v948_v5  ;;  %v960_v16 = vpack.c.bf16 %v359_v15, %v358_v14  ;;  %v964_v19 = vpack.c.bf16 %v361_v18, %v360_v17  ;;  %v362_v20 = vld [vmem:[%s1632_s10 + $0x60] sm:$0xff]  ;;  %v363_v21 = vld [vmem:[%s1632_s10 + $0x68] sm:$0xff]  ;;  %v364_v23 = vld [vmem:[%s1632_s10 + $0x70] sm:$0xff]  ;;  %s1351_s24 = smov [#allocation8]  }
  0x78   : > { %908 = vmatprep.mubr.f32.mxu0 %v326_v9  ;;  %926 = vmatprep.mubr.f32.mxu1 %v338_v10  ;;  %v968_v22 = vpack.c.bf16 %v363_v21, %v362_v20  ;;  %v365_v24 = vld [vmem:[%s1632_s10 + $0x78] sm:$0xff]  ;;  %v327_v26 = vld [vmem:[%s1625_s18 + $0x8] sm:$0xff]  ;;  %v328_v28 = vld [vmem:[%s1625_s18 + $0x10] sm:$0xff] }
  0x79   : > { %v972_v25 = vpack.c.bf16 %v365_v24, %v364_v23  ;;  %v339_v27 = vld [vmem:[%s1625_s18 + $0x68] sm:$0xff]  ;;  %v340_v29 = vld [vmem:[%s1625_s18 + $0x70] sm:$0xff]  ;;  %v329_v30 = vld [vmem:[%s1625_s18 + $0x18] sm:$0xff]  ;;  %s272_s5 = scalar_lea.vmem %s1872_s29, %s271_s4  ;;  %s1750_s4 = scalar_lea.sflag [#allocation5], %s265_s8 }
  0x7a   : > { %951 = vmatpush3.bf16.msra.mxu0 %v948_v5  ;;  %985 = vmatpush3.bf16.msra.mxu1 %v948_v5  ;;  %v341_v31 = vld [vmem:[%s1625_s18 + $0x78] sm:$0xff]  ;;  %v330_v32 = vld [vmem:[%s1625_s18 + $0x20] sm:$0xff]  ;;  %v331_v34 = vld [vmem:[%s1625_s18 + $0x28] sm:$0xff]  ;;  %s1198_s29 = sshll.u32 %s1351_s24, 4  ;;  %s1199_s29 = int_to_ptr.vmem [resolvable:$false] %s1198_s29 }
  0x7b   : > { %953 = vmatprep.subr.bf16.mxu0 %v952_v8  ;;  %978 = vmatprep.subr.bf16.mxu1 %v952_v8  ;;  %v342_v33 = vld [vmem:[%s1625_s18 + $0x80] sm:$0xff]  ;;  %v343_v35 = vld [vmem:[%s1625_s18 + $0x88] sm:$0xff]  ;;  %v332_v36 = vld [vmem:[%s1625_s18 + $0x30] sm:$0xff]  ;;  %s1014_s11 = smul.u32 72, %s1873_s9 }
  0x7c   : > { %v344_v37 = vld [vmem:[%s1625_s18 + $0x90] sm:$0xff]  ;;  %v333_v38 = vld [vmem:[%s1625_s18 + $0x38] sm:$0xff]  ;;  %v334_v40 = vld [vmem:[%s1625_s18 + $0x40] sm:$0xff]  ;;  %p1876_p9 = scmp.ne.s32.totalorder %s1875_s7, 0 }
  0x7d   : > { %v345_v39 = vld [vmem:[%s1625_s18 + $0x98] sm:$0xff]  ;;  %v346_v41 = vld [vmem:[%s1625_s18 + $0xa0] sm:$0xff]  ;;  %v335_v42 = vld [vmem:[%s1625_s18 + $0x48] sm:$0xff]  ;;  %s694_s28 = sadd.s32 %s1328_s21, %s1014_s11  ;;  %s697_s21 = sshll.u32 %s1692_s2, 4  ;;  %s1740_s21 = int_to_ptr.vmem [resolvable:$true] %s697_s21 }
  0x7e   : > { %955 = vmatpush3.bf16.msra.mxu0 %v952_v8  ;;  %986 = vmatpush3.bf16.msra.mxu1 %v952_v8  ;;  %v347_v43 = vld [vmem:[%s1625_s18 + $0xa8] sm:$0xff]  ;;  %v336_v44 = vld [vmem:[%s1625_s18 + $0x50] sm:$0xff]  ;;  %v337_v46 = vld [vmem:[%s1625_s18 + $0x58] sm:$0xff]  ;;  %s832_s26 = sshll.u32 %s694_s28, 7  ;;  %s1194_s15 = scalar_lea.vmem %s1740_s21, 3072 }
  0x7f   : > { %957 = vmatprep.subr.bf16.mxu0 %v956_v13  ;;  %979 = vmatprep.subr.bf16.mxu1 %v956_v13  ;;  %v348_v45 = vld [vmem:[%s1625_s18 + $0xb0] sm:$0xff]  ;;  %v349_v47 = vld [vmem:[%s1625_s18 + $0xb8] sm:$0xff]  ;;  %v1686_v48 = vld [vmem:[%s272_s5] ss:$0 sm:$0xff]  ;;  %s1736_s10 = scalar_lea.hbm %s1874_s3, %s832_s26  ;;  %p1195_p12 = scmp.ne.s32.totalorder %s1740_s21, %s1194_s15 }
  0x80   : > { %s1200_s5 = scalar_lea.vmem %s1199_s29, 6144  ;;  %p1201_p10 = scmp.lt.s32.totalorder %s1740_s21, %s1199_s29 }
  0x81   : > { %p1196_p0 = pnand %p1195_p12, %p1876_p9  ;;  %p1202_p8 = scmp.lt.s32.totalorder %s1200_s5, %s1194_s15 }
  0x82   : > { %959 = vmatpush3.bf16.msra.mxu0 %v956_v13  ;;  %987 = vmatpush3.bf16.msra.mxu1 %v956_v13 }
  0x83   : > { %961 = vmatprep.subr.bf16.mxu0 %v960_v16  ;;  %980 = vmatprep.subr.bf16.mxu1 %v960_v16  ;;  %p1197_p4 = pneg %p1196_p0  ;;  %p1203_p11 = por %p1202_p8, %p1201_p10 }
  0x85   : > { %p1204_p2 = pnand %p1203_p11, %p1197_p4 }
  0x86   : > { %963 = vmatpush3.bf16.msra.mxu0 %v960_v16  ;;  %988 = vmatpush3.bf16.msra.mxu1 %v960_v16 }
  0x87   : > { %965 = vmatprep.subr.bf16.mxu0 %v964_v19  ;;  %981 = vmatprep.subr.bf16.mxu1 %v964_v19 }
  0x8a   : > { %967 = vmatpush3.bf16.msra.mxu0 %v964_v19  ;;  %989 = vmatpush3.bf16.msra.mxu1 %v964_v19 }
  0x8b   : > { %969 = vmatprep.subr.bf16.mxu0 %v968_v22  ;;  %982 = vmatprep.subr.bf16.mxu1 %v968_v22 }
  0x8e   : > { %971 = vmatpush3.bf16.msra.mxu0 %v968_v22  ;;  %990 = vmatpush3.bf16.msra.mxu1 %v968_v22 }
  0x8f   : > { %973 = vmatprep.subr.bf16.mxu0 %v972_v25  ;;  %983 = vmatprep.subr.bf16.mxu1 %v972_v25 }
  0x92   : > { %975 = vmatpush3.bf16.msra.mxu0 %v972_v25  ;;  %991 = vmatpush3.bf16.msra.mxu1 %v972_v25 }
  0x95   : > { %909 = vmatmul.mubr.f32.vlgmr.msra.gmra.mrb[0].mxu0 %v327_v26  ;;  %927 = vmatmul.mubr.f32.vlgmr.msra.gmra.mrb[0].mxu1 %v339_v27 }
  0x96   : > { %911 = vmatprep.mubr.f32.mxu0 %v328_v28  ;;  %929 = vmatprep.mubr.f32.mxu1 %v340_v29 }
  0x99   : > { %912 = vmatmul.mubr.f32.gmra.mrb[2].mxu0 %v329_v30  ;;  %930 = vmatmul.mubr.f32.gmra.mrb[2].mxu1 %v341_v31 }
  0x9a   : > { %914 = vmatprep.mubr.f32.mxu0 %v330_v32  ;;  %932 = vmatprep.mubr.f32.mxu1 %v342_v33 }
  0x9d   : > { %915 = vmatmul.mubr.f32.gmra.mrb[4].mxu0 %v331_v34  ;;  %933 = vmatmul.mubr.f32.gmra.mrb[4].mxu1 %v343_v35 }
  0x9e   : > { %917 = vmatprep.mubr.f32.mxu0 %v332_v36  ;;  %935 = vmatprep.mubr.f32.mxu1 %v344_v37 }
  0xa1   : > { %918 = vmatmul.mubr.f32.gmra.mrb[6].mxu0 %v333_v38  ;;  %936 = vmatmul.mubr.f32.gmra.mrb[6].mxu1 %v345_v39 }
  0xa2   : > { %920 = vmatprep.mubr.f32.mxu0 %v334_v40  ;;  %938 = vmatprep.mubr.f32.mxu1 %v346_v41 }
  0xa5   : > { %921 = vmatmul.mubr.f32.gmra.mrb[8].mxu0 %v335_v42  ;;  %939 = vmatmul.mubr.f32.gmra.mrb[8].mxu1 %v347_v43 }
  0xa6   : > { %923 = vmatprep.mubr.f32.mxu0 %v336_v44  ;;  %941 = vmatprep.mubr.f32.mxu1 %v348_v45 }
  0xa9   : > { %924 = vmatmul.mubr.f32.gmra.mrb[10].mxu0 %v337_v46  ;;  %942 = vmatmul.mubr.f32.gmra.mrb[10].mxu1 %v349_v47 }
 0x168   : > { %v910_v49 = vpop.f32.mrb[0].mxu0  ;;  %v928_v50 = vpop.f32.mrb[0].mxu1 }
 0x169   : > { %v634_v51 = vadd.f32 %v910_v49, %v1686_v48  ;;  %v646_v52 = vadd.f32 %v928_v50, %v1686_v48  ;;  %v432_v53 = vpop.f32.mrb[1].mxu0  ;;  %v492_v54 = vpop.f32.mrb[1].mxu1 }
 0x16a   : > { %v633_v55 = vadd.f32 %v1686_v48, %v432_v53  ;;  %v645_v56 = vadd.f32 %v1686_v48, %v492_v54 }
 0x16b   : > { %658 = vst [vmem:[%s1692_s2 + $0x8] sm:$0xff] %v634_v51  ;;  %670 = vst [vmem:[%s1692_s2 + $0x68] sm:$0xff] %v646_v52 }
 0x16c   : > { %657 = vst [vmem:[%s1692_s2] sm:$0xff] %v633_v55  ;;  %669 = vst [vmem:[%s1692_s2 + $0x60] sm:$0xff] %v645_v56  ;;  %v913_v57 = vpop.f32.mrb[2].mxu0  ;;  %v931_v58 = vpop.f32.mrb[2].mxu1 }
 0x16d   : > { %v636_v59 = vadd.f32 %v913_v57, %v1686_v48  ;;  %v648_v60 = vadd.f32 %v931_v58, %v1686_v48  ;;  %v442_v61 = vpop.f32.mrb[3].mxu0  ;;  %v502_v62 = vpop.f32.mrb[3].mxu1 }
 0x16e   : > { %v635_v63 = vadd.f32 %v1686_v48, %v442_v61  ;;  %v647_v0 = vadd.f32 %v1686_v48, %v502_v62 }
 0x16f   : > { %660 = vst [vmem:[%s1692_s2 + $0x18] sm:$0xff] %v636_v59  ;;  %672 = vst [vmem:[%s1692_s2 + $0x78] sm:$0xff] %v648_v60 }
 0x170   : > { %659 = vst [vmem:[%s1692_s2 + $0x10] sm:$0xff] %v635_v63  ;;  %671 = vst [vmem:[%s1692_s2 + $0x70] sm:$0xff] %v647_v0  ;;  %v916_v1 = vpop.f32.mrb[4].mxu0  ;;  %v934_v2 = vpop.f32.mrb[4].mxu1 }
 0x171   : > { %v638_v3 = vadd.f32 %v916_v1, %v1686_v48  ;;  %v650_v4 = vadd.f32 %v934_v2, %v1686_v48  ;;  %v452_v5 = vpop.f32.mrb[5].mxu0  ;;  %v512_v6 = vpop.f32.mrb[5].mxu1 }
 0x172   : > { %v637_v7 = vadd.f32 %v1686_v48, %v452_v5  ;;  %v649_v8 = vadd.f32 %v1686_v48, %v512_v6 }
 0x173   : > { %662 = vst [vmem:[%s1692_s2 + $0x28] sm:$0xff] %v638_v3  ;;  %674 = vst [vmem:[%s1692_s2 + $0x88] sm:$0xff] %v650_v4 }
 0x174   : > { %661 = vst [vmem:[%s1692_s2 + $0x20] sm:$0xff] %v637_v7  ;;  %673 = vst [vmem:[%s1692_s2 + $0x80] sm:$0xff] %v649_v8  ;;  %v919_v9 = vpop.f32.mrb[6].mxu0  ;;  %v937_v10 = vpop.f32.mrb[6].mxu1 }
 0x175   : > { %v640_v11 = vadd.f32 %v919_v9, %v1686_v48  ;;  %v652_v12 = vadd.f32 %v937_v10, %v1686_v48  ;;  %v462_v13 = vpop.f32.mrb[7].mxu0  ;;  %v522_v14 = vpop.f32.mrb[7].mxu1 }
 0x176   : > { %v639_v15 = vadd.f32 %v1686_v48, %v462_v13  ;;  %v651_v16 = vadd.f32 %v1686_v48, %v522_v14 }
 0x177   : > { %664 = vst [vmem:[%s1692_s2 + $0x38] sm:$0xff] %v640_v11  ;;  %676 = vst [vmem:[%s1692_s2 + $0x98] sm:$0xff] %v652_v12 }
 0x178   : > { %663 = vst [vmem:[%s1692_s2 + $0x30] sm:$0xff] %v639_v15  ;;  %675 = vst [vmem:[%s1692_s2 + $0x90] sm:$0xff] %v651_v16  ;;  %v922_v17 = vpop.f32.mrb[8].mxu0  ;;  %v940_v18 = vpop.f32.mrb[8].mxu1 }
 0x179   : > { %v642_v19 = vadd.f32 %v922_v17, %v1686_v48  ;;  %v654_v20 = vadd.f32 %v940_v18, %v1686_v48  ;;  %v472_v21 = vpop.f32.mrb[9].mxu0  ;;  %v532_v22 = vpop.f32.mrb[9].mxu1 }
 0x17a   : > { %v641_v23 = vadd.f32 %v1686_v48, %v472_v21  ;;  %v653_v24 = vadd.f32 %v1686_v48, %v532_v22 }
 0x17b   : > { %666 = vst [vmem:[%s1692_s2 + $0x48] sm:$0xff] %v642_v19  ;;  %678 = vst [vmem:[%s1692_s2 + $0xa8] sm:$0xff] %v654_v20 }
 0x17c   : > { %665 = vst [vmem:[%s1692_s2 + $0x40] sm:$0xff] %v641_v23  ;;  %677 = vst [vmem:[%s1692_s2 + $0xa0] sm:$0xff] %v653_v24  ;;  %v925_v25 = vpop.f32.mrb[10].mxu0  ;;  %v943_v26 = vpop.f32.mrb[10].mxu1 }
 0x17d   : > { %v644_v27 = vadd.f32 %v925_v25, %v1686_v48  ;;  %v656_v28 = vadd.f32 %v943_v26, %v1686_v48  ;;  %v482_v29 = vpop.f32.mrb[11].mxu0  ;;  %v542_v30 = vpop.f32.mrb[11].mxu1 }
 0x17e   : > { %v643_v31 = vadd.f32 %v1686_v48, %v482_v29  ;;  %v655_v32 = vadd.f32 %v1686_v48, %v542_v30 }
 0x17f   : > { %668 = vst [vmem:[%s1692_s2 + $0x58] sm:$0xff] %v644_v27  ;;  %680 = vst [vmem:[%s1692_s2 + $0xb8] sm:$0xff] %v656_v28 }
 0x180   : > { %667 = vst [vmem:[%s1692_s2 + $0x50] sm:$0xff] %v643_v31  ;;  %679 = vst [vmem:[%s1692_s2 + $0xb0] sm:$0xff] %v655_v32 }
 0x181   : > { %1207 = shalt.err (!%p1204_p2)
}
 0x182   : > { %s1208_s8 = scalar_lea.hbm %s1736_s10, 3072  ;;  %s1212_s9 = scalar_lea.hbm %s1874_s3, 18432 }
 0x183   : > { %p1209_p5 = scmp.ne.s32.totalorder %s1736_s10, %s1208_s8  ;;  %p1213_p13 = scmp.lt.u32.totalorder %s1736_s10, %s1874_s3 }
 0x184   : > { %p1214_p6 = scmp.lt.u32.totalorder %s1212_s9, %s1208_s8  ;;  %p1216_p12 = scmp.lt.u32.totalorder %s1208_s8, %s1736_s10 }
 0x185   : > { %p1210_p3 = pnand %p1209_p5, %p1876_p9 }
 0x186   : > { %p1215_p1 = por %p1214_p6, %p1213_p13 }
 0x187   : > { %p1211_p7 = pneg %p1210_p3 }
 0x188   : > { %p1217_p0 = por %p1216_p12, %p1215_p1 }
 0x18a   : > { %p1218_p4 = pnand %p1217_p0, %p1211_p7 }
 0x18c   : > { %1221 = shalt.err (!%p1218_p4)
}
 0x18d   : > { %s1352_s26 = smov 128   ;;  %s1353_s18 = smov 384  }
 0x18e   : > { %s1354_s22 = smov 8  }
 0x18f   : > { %1000 = dma.vmem_to_hbm [thread:$0]  (%p1876_p9), %s1740_s21, 3072, %s1736_s10, %s1750_s4, %s1352_s26, %s1353_s18, %s1354_s22  }
 0x190 PF: > { %p1015_p10 = scmp.ge.s32.totalorder %s1344_s25, 2  ;;  %s712_s15 = sand.u32 1, %s1292_s12  }
 0x191   : > { %p1877_p8 = scmp.ne.s32.totalorder %s1865_s30, 0  ;;  %s713_s24 = scalar_lea.sflag [#allocation5], %s712_s15 }
 0x193   : > { %p1010_p11 = pnand %p1015_p10, %p1877_p8 }
 0x195   : > { %1287 = dma.done.wait (!%p1010_p11), %s713_s24, 3072  }
 0x196   : > { %1289 = vsyncadd (!%p1010_p11), %s713_s24, 4294964224  ;;  %s22_s25 = sadd.s32 1, %s1344_s25   ;;  %s1879_s21 = sld [smem:[#allocation16_spill]] }
 0x197   : > { %p1779_p2 = scmp.ge.s32.totalorder %s22_s25, 8   ;;  %s1880_s22 = sld [smem:[#allocation13_spill]] }
 0x198   : > { %s1881_s30 = sld [smem:[#allocation14_spill]]  ;;  %s1882_s24 = sld [smem:[#allocation15_spill]] }
 0x199   : > { %s1883_s12 = smov %s1296_s13  ;;  %s1884_s13 = smov %s1300_s14 }
 0x19a   : > { %s1885_s14 = smov %s1569_s0  ;;  %s1886_s15 = smov %s1308_s16 }
 0x19b   : > { %s1887_s16 = smov %s1312_s17  ;;  %s1889_s18 = smov %s1320_s19 }
 0x19c   : > { %s1888_s17 = smov %s1879_s21  ;;  %s1890_s19 = smov %s1324_s20 }
 0x19d   : > { %s1891_s20 = smov %s1566_s27  ;;  %s1892_s21 = smov %s1336_s23 }
 0x19e   : > { %s1893_s23 = smov %s1881_s30  ;;  %21 = sbr.rel (!%p1779_p2) target bundleno = 16 (0x10), region = 101 }
 0x1a5   :  { %718 = vsyncpa [#allocation4], 1 }
 0x1a6   :  { %720 = vsyncpa [#allocation4 + $0x1], 1 }
 0x1a7   :  { %721 = vsyncpa [#allocation7], 1 }
 0x1a8   :  { %723 = vsyncpa [#allocation7 + $0x1], 1 }
 0x1a9   :  { %724 = vsyncpa [#allocation5], 1 }
 0x1aa   :  { %726 = vsyncpa [#allocation5 + $0x1], 1 }

</bundles_post_ra>
